<compile_context>
chip_gen: v7x
topology: tpu7x:2x2x1
jax: 0.10.0
libtpu: 0.0.40
codegen_flags: <defaults>
</compile_context>

<pallas_src>
import functools
import math

import jax
import jax.numpy as jnp
from jax.experimental import pallas as pl
from jax.experimental.pallas import tpu as pltpu

_LOG2E = math.log2(math.e)
_MASK_VALUE = -0.7 * float(jnp.finfo(jnp.float32).max)


def _pick_tile(s, preferred):
    for t in (preferred, 256, 128, 64, 32, 16, 8):
        if t <= s and s % t == 0:
            return t
    return s


def _preferred_kv_tile():
    try:
        kind = jax.devices()[0].device_kind.lower()
    except Exception:
        kind = ""
    if "v6" in kind or "v7" in kind:
        return 256   # wider kv tile fills the 2x256x256 MXU on v6e/v7x
    return 128       # v5e (and older): native 128 granularity


def _lane_tile(x, lanes):
    """Broadcast a lane-replicated (rows, R) array to (rows, lanes)."""
    r = x.shape[-1]
    if r == 1 or r == lanes:
        return x
    assert lanes % r == 0
    return jnp.tile(x, (1, lanes // r))


def _flash_kernel(q_ref, k_ref, v_ref, o_ref, m_sc, l_sc, acc_sc,
                  *, scale, causal):
    # q_ref: (tq, D) bf16; k_ref/v_ref: (tk, D) bf16; o_ref: (tq, D).
    # m_sc/l_sc: (tq, R) f32 (R=128 lane-replicated, or 1); acc_sc: (tq, D) f32.
    tq, d = q_ref.shape
    tk = k_ref.shape[0]
    qi = pl.program_id(2)
    ki = pl.program_id(3)

    @pl.when(ki == 0)
    def _init():
        m_sc[...] = jnp.full_like(m_sc, _MASK_VALUE)
        l_sc[...] = jnp.zeros_like(l_sc)
        acc_sc[...] = jnp.zeros_like(acc_sc)

    scale_log2e = jnp.float32(scale * _LOG2E)

    def _body(apply_mask):
        # bf16 operands straight into the MXU, f32 accumulation; contract D
        # directly (no materialized transpose).
        s = jax.lax.dot_general(
            q_ref[...], k_ref[...], (((1,), (1,)), ((), ())),
            preferred_element_type=jnp.float32)          # (tq, tk) f32
        s = s * scale_log2e                              # log2-domain scores

        if apply_mask:
            # visible iff (ki*tk + col) <= (qi*tq + row)
            col = jax.lax.broadcasted_iota(jnp.int32, (tq, tk), 1)
            row = jax.lax.broadcasted_iota(jnp.int32, (tq, tk), 0)
            s = jnp.where(col - row <= qi * tq - ki * tk, s, _MASK_VALUE)

        m_prev = m_sc[...]                               # (tq, R)
        m_cur = jnp.max(s, axis=-1, keepdims=True)       # (tq, 1)
        m_new = jnp.maximum(m_prev, m_cur)               # (tq, R)
        alpha = jnp.exp2(m_prev - m_new)                 # (tq, R)
        p = jnp.exp2(s - _lane_tile(m_new, tk))          # (tq, tk)
        l_sc[...] = alpha * l_sc[...] + jnp.sum(p, axis=-1, keepdims=True)
        acc_sc[...] = _lane_tile(alpha, d) * acc_sc[...] + jax.lax.dot_general(
            p.astype(v_ref.dtype), v_ref[...], (((1,), (0,)), ((), ())),
            preferred_element_type=jnp.float32)
        m_sc[...] = m_new

    if causal:
        # Skip kv tiles lying entirely above the diagonal of this q tile.
        @pl.when(ki * tk <= qi * tq + tq - 1)
        def _run():
            fully_visible = ki * tk + tk - 1 <= qi * tq

            @pl.when(fully_visible)
            def _():
                _body(apply_mask=False)

            @pl.when(jnp.logical_not(fully_visible))
            def _():
                _body(apply_mask=True)
    else:
        _body(apply_mask=False)

    @pl.when(ki == pl.num_programs(3) - 1)
    def _finalize():
        inv_l = pl.reciprocal(l_sc[...], approx=True)    # EUP slot
        o_ref[...] = (acc_sc[...] * _lane_tile(inv_l, d)).astype(o_ref.dtype)


def flash_attention(qkv, softmax_scale=None, causal=False,
                    key_padding_mask=None, cu_seqlens=None, max_s=None,
                    need_weights=False):
    """JAX/Pallas equivalent of FlashAttention.forward (eval mode).

    qkv: (B, S, 3, H, D), dtype float16/bfloat16.
    Returns (output, None) with output of shape (B, S, H, D), dtype of qkv.
    """
    assert not need_weights
    # TODO(synk): key_padding_mask / cu_seqlens (varlen) and dropout unsupported.
    assert key_padding_mask is None and cu_seqlens is None
    assert qkv.ndim == 5 and qkv.shape[2] == 3, "expected (B, S, 3, H, D)"
    assert qkv.dtype in (jnp.float16, jnp.bfloat16)

    B, S, _, H, D = qkv.shape
    scale = float(softmax_scale) if softmax_scale is not None else 1.0 / math.sqrt(D)
    orig_dtype = qkv.dtype
    # bf16 is the native MXU input dtype (fp16 inputs are computed in bf16).
    qkv = qkv.astype(jnp.bfloat16)

    tq = _pick_tile(S, 128)
    tk = _pick_tile(S, _preferred_kv_tile())
    grid = (B, H, S // tq, S // tk)
    kernel = functools.partial(_flash_kernel, scale=scale, causal=causal)

    def kv_block(qi, ki):
        if causal:
            # Clamp above-diagonal steps to the last visible kv block so Pallas
            # re-uses the resident block (no dead kv DMA; compute is skipped).
            return jnp.minimum(ki, (qi * tq + tq - 1) // tk)
        return ki

    cparams = pltpu.CompilerParams(
        dimension_semantics=("parallel", "parallel", "parallel", "arbitrary"))

    if D % 128 == 0:
        # Fast path: carve q/k/v blocks straight out of the packed (B,S,3*H*D)
        # view; write the output lane-dense as (B,S,H*D).  No relayout passes.
        x = qkv.reshape(B, S, 3 * H * D)
        stats_lanes = 128 if tk % 128 == 0 else 1
        out = pl.pallas_call(
            kernel,
            out_shape=jax.ShapeDtypeStruct((B, S, H * D), jnp.bfloat16),
            grid=grid,
            in_specs=[
                pl.BlockSpec((None, tq, D), lambda b, h, qi, ki: (b, qi, h)),
                pl.BlockSpec((None, tk, D),
                             lambda b, h, qi, ki: (b, kv_block(qi, ki), H + h)),
                pl.BlockSpec((None, tk, D),
                             lambda b, h, qi, ki: (b, kv_block(qi, ki), 2 * H + h)),
            ],
            out_specs=pl.BlockSpec((None, tq, D), lambda b, h, qi, ki: (b, qi, h)),
            scratch_shapes=[
                pltpu.VMEM((tq, stats_lanes), jnp.float32),  # running max m
                pltpu.VMEM((tq, stats_lanes), jnp.float32),  # running denom l
                pltpu.VMEM((tq, D), jnp.float32),            # output accumulator
            ],
            compiler_params=cparams,
        )(x, x, x)
        output = out.reshape(B, S, H, D).astype(orig_dtype)
    else:
        # Fallback (head_dim not a multiple of 128): one relayout pass so every
        # block's last dim equals the full head_dim (lane-constraint safe).
        qkv_t = jnp.transpose(qkv, (2, 0, 3, 1, 4))       # (3, B, H, S, D)
        out = pl.pallas_call(
            kernel,
            out_shape=jax.ShapeDtypeStruct((B, H, S, D), jnp.bfloat16),
            grid=grid,
            in_specs=[
                pl.BlockSpec((None, None, None, tq, D),
                             lambda b, h, qi, ki: (0, b, h, qi, 0)),
                pl.BlockSpec((None, None, None, tk, D),
                             lambda b, h, qi, ki: (1, b, h, kv_block(qi, ki), 0)),
                pl.BlockSpec((None, None, None, tk, D),
                             lambda b, h, qi, ki: (2, b, h, kv_block(qi, ki), 0)),
            ],
            out_specs=pl.BlockSpec((None, None, tq, D),
                                   lambda b, h, qi, ki: (b, h, qi, 0)),
            scratch_shapes=[
                pltpu.VMEM((tq, 1), jnp.float32),
                pltpu.VMEM((tq, 1), jnp.float32),
                pltpu.VMEM((tq, D), jnp.float32),
            ],
            compiler_params=cparams,
        )(qkv_t, qkv_t, qkv_t)
        output = jnp.transpose(out, (0, 2, 1, 3)).astype(orig_dtype)

    return output, None


def _reference_attention(qkv, softmax_scale=None, causal=False):
    # Pure-JAX f32 reference for correctness checking.
    B, S, _, H, D = qkv.shape
    scale = softmax_scale if softmax_scale is not None else 1.0 / math.sqrt(D)
    q = qkv[:, :, 0].astype(jnp.float32)
    k = qkv[:, :, 1].astype(jnp.float32)
    v = qkv[:, :, 2].astype(jnp.float32)
    s = jnp.einsum("bqhd,bkhd->bhqk", q, k) * scale
    if causal:
        mask = jnp.tril(jnp.ones((S, S), dtype=bool))
        s = jnp.where(mask[None, None], s, -jnp.inf)
    p = jax.nn.softmax(s, axis=-1)
    o = jnp.einsum("bhqk,bkhd->bqhd", p, v)
    return o.astype(qkv.dtype)


if __name__ == "__main__":
    def _check(B, S, H, D, causal, tol=5e-2):
        key = jax.random.PRNGKey(0)
        qkv = jax.random.normal(key, (B, S, 3, H, D), jnp.float32).astype(jnp.bfloat16)
        out, attn_w = flash_attention(qkv, causal=causal)
        out = jax.block_until_ready(out)
        assert attn_w is None
        assert out.shape == (B, S, H, D)
        assert out.dtype == qkv.dtype
        ref = _reference_attention(qkv, causal=causal)
        err = float(jnp.max(jnp.abs(out.astype(jnp.float32) - ref.astype(jnp.float32))))
        assert err < tol, f"B={B} S={S} H={H} D={D} causal={causal}: max abs err {err}"

    # Packed fast path (head_dim % 128 == 0): single-tile, multi-tile, causal.
    _check(2, 128, 2, 128, causal=False)
    _check(1, 512, 1, 128, causal=False)
    _check(1, 512, 1, 128, causal=True)
    # Fallback path (head_dim < 128), matching the original small module shapes.
    _check(2, 8, 2, 32, causal=False)
    _check(1, 256, 2, 32, causal=True)

    print("KERNEL_OK")
</pallas_src>

<mosaic_0001>
module attributes {stable_mosaic.version = 11 : i64} {
  func.func @_flash_kernel(%arg0: i32, %arg1: i32, %arg2: i32, %arg3: i32, %arg4: memref<1x128x128xbf16, #tpu.memory_space<vmem>>, %arg5: memref<1x128x128xbf16, #tpu.memory_space<vmem>>, %arg6: memref<1x128x128xbf16, #tpu.memory_space<vmem>>, %arg7: memref<1x128x128xbf16, #tpu.memory_space<vmem>>, %arg8: memref<128x128xf32, #tpu.memory_space<vmem>>, %arg9: memref<128x128xf32, #tpu.memory_space<vmem>>, %arg10: memref<128x128xf32, #tpu.memory_space<vmem>>) attributes {dimension_semantics = [#tpu.dimension_semantics<parallel>, #tpu.dimension_semantics<parallel>, #tpu.dimension_semantics<parallel>, #tpu.dimension_semantics<arbitrary>], iteration_bounds = array<i64: 2, 2, 1, 1>, scalar_prefetch = 0 : i64, scratch_operands = 3 : i64, tpu.core_type = #tpu.core_type<tc>, window_params = [{transform_indices = @transform_0, window_bounds = array<i64: 1, 128, 128>}, {transform_indices = @transform_1, window_bounds = array<i64: 1, 128, 128>}, {transform_indices = @transform_2, window_bounds = array<i64: 1, 128, 128>}, {transform_indices = @transform_3, window_bounds = array<i64: 1, 128, 128>}]} {
    %c0_i32 = arith.constant 0 : i32
    %0 = arith.cmpi eq, %arg3, %c0_i32 : i32
    %1 = arith.extui %0 : i1 to i32
    %c0_i32_0 = arith.constant 0 : i32
    %2 = arith.cmpi ne, %1, %c0_i32_0 : i32
    scf.if %2 {
      %cst_27 = arith.constant -2.38197633E+38 : f32
      %38 = vector.broadcast %cst_27 : f32 to vector<128x128xf32>
      %c0_28 = arith.constant 0 : index
      %c0_29 = arith.constant 0 : index
      %39 = vector.load %arg8[%c0_28, %c0_29] : memref<128x128xf32, #tpu.memory_space<vmem>>, vector<128x128xf32>
      tpu.vector_store %arg8[%c0_28, %c0_29], %38 {strides = array<i32>} : memref<128x128xf32, #tpu.memory_space<vmem>>, vector<128x128xf32>,
      %cst_30 = arith.constant 0.000000e+00 : f32
      %40 = vector.broadcast %cst_30 : f32 to vector<128x128xf32>
      %c0_31 = arith.constant 0 : index
      %c0_32 = arith.constant 0 : index
      %41 = vector.load %arg9[%c0_31, %c0_32] : memref<128x128xf32, #tpu.memory_space<vmem>>, vector<128x128xf32>
      tpu.vector_store %arg9[%c0_31, %c0_32], %40 {strides = array<i32>} : memref<128x128xf32, #tpu.memory_space<vmem>>, vector<128x128xf32>,
      %cst_33 = arith.constant 0.000000e+00 : f32
      %42 = vector.broadcast %cst_33 : f32 to vector<128x128xf32>
      %c0_34 = arith.constant 0 : index
      %c0_35 = arith.constant 0 : index
      %43 = vector.load %arg10[%c0_34, %c0_35] : memref<128x128xf32, #tpu.memory_space<vmem>>, vector<128x128xf32>
      tpu.vector_store %arg10[%c0_34, %c0_35], %42 {strides = array<i32>} : memref<128x128xf32, #tpu.memory_space<vmem>>, vector<128x128xf32>,
    } else {
    }
    %c0 = arith.constant 0 : index
    %c0_1 = arith.constant 0 : index
    %c0_2 = arith.constant 0 : index
    %3 = vector.load %arg4[%c0, %c0_1, %c0_2] : memref<1x128x128xbf16, #tpu.memory_space<vmem>>, vector<1x128x128xbf16>
    %4 = vector.shape_cast %3 : vector<1x128x128xbf16> to vector<128x128xbf16>
    %c0_3 = arith.constant 0 : index
    %c0_4 = arith.constant 0 : index
    %c0_5 = arith.constant 0 : index
    %5 = vector.load %arg5[%c0_3, %c0_4, %c0_5] : memref<1x128x128xbf16, #tpu.memory_space<vmem>>, vector<1x128x128xbf16>
    %6 = vector.shape_cast %5 : vector<1x128x128xbf16> to vector<128x128xbf16>
    %cst = arith.constant dense<0.000000e+00> : vector<128x128xf32>
    %7 = tpu.matmul %4, %6, %cst {dimension_numbers = #tpu.dot_dimension_numbers<[1], [1], [0], [0], [0, 0, 1, 0], [], []>} : vector<128x128xbf16>, vector<128x128xbf16>, vector<128x128xf32> -> vector<128x128xf32>
    %cst_6 = arith.constant 0.127517432 : f32
    %8 = vector.broadcast %cst_6 : f32 to vector<128x128xf32>
    %9 = arith.mulf %7, %8 : vector<128x128xf32>
    %c0_7 = arith.constant 0 : index
    %c0_8 = arith.constant 0 : index
    %10 = vector.load %arg8[%c0_7, %c0_8] : memref<128x128xf32, #tpu.memory_space<vmem>>, vector<128x128xf32>
    %cst_9 = arith.constant dense<0xFF800000> : vector<128xf32>
    %11 = vector.multi_reduction <maximumf>, %9, %cst_9 [1] : vector<128x128xf32> to vector<128xf32>
    %12 = vector.shape_cast %11 : vector<128xf32> to vector<128x1xf32>
    %13 = vector.broadcast %12 : vector<128x1xf32> to vector<128x128xf32>
    %14 = arith.maximumf %10, %13 : vector<128x128xf32>
    %15 = arith.subf %10, %14 : vector<128x128xf32>
    %16 = math.exp2 %15 : vector<128x128xf32>
    %17 = arith.subf %9, %14 : vector<128x128xf32>
    %18 = math.exp2 %17 : vector<128x128xf32>
    %c0_10 = arith.constant 0 : index
    %c0_11 = arith.constant 0 : index
    %19 = vector.load %arg9[%c0_10, %c0_11] : memref<128x128xf32, #tpu.memory_space<vmem>>, vector<128x128xf32>
    %20 = arith.mulf %16, %19 : vector<128x128xf32>
    %cst_12 = arith.constant dense<0.000000e+00> : vector<128xf32>
    %21 = vector.multi_reduction <add>, %18, %cst_12 [1] : vector<128x128xf32> to vector<128xf32>
    %22 = vector.shape_cast %21 : vector<128xf32> to vector<128x1xf32>
    %23 = vector.broadcast %22 : vector<128x1xf32> to vector<128x128xf32>
    %24 = arith.addf %20, %23 : vector<128x128xf32>
    %c0_13 = arith.constant 0 : index
    %c0_14 = arith.constant 0 : index
    %25 = vector.load %arg9[%c0_13, %c0_14] : memref<128x128xf32, #tpu.memory_space<vmem>>, vector<128x128xf32>
    tpu.vector_store %arg9[%c0_13, %c0_14], %24 {strides = array<i32>} : memref<128x128xf32, #tpu.memory_space<vmem>>, vector<128x128xf32>,
    %c0_15 = arith.constant 0 : index
    %c0_16 = arith.constant 0 : index
    %26 = vector.load %arg10[%c0_15, %c0_16] : memref<128x128xf32, #tpu.memory_space<vmem>>, vector<128x128xf32>
    %27 = arith.mulf %16, %26 : vector<128x128xf32>
    %28 = arith.truncf %18 : vector<128x128xf32> to vector<128x128xbf16>
    %c0_17 = arith.constant 0 : index
    %c0_18 = arith.constant 0 : index
    %c0_19 = arith.constant 0 : index
    %29 = vector.load %arg6[%c0_17, %c0_18, %c0_19] : memref<1x128x128xbf16, #tpu.memory_space<vmem>>, vector<1x128x128xbf16>
    %30 = vector.shape_cast %29 : vector<1x128x128xbf16> to vector<128x128xbf16>
    %cst_20 = arith.constant dense<0.000000e+00> : vector<128x128xf32>
    %31 = tpu.matmul %28, %30, %cst_20 {dimension_numbers = #tpu.dot_dimension_numbers<[1], [0], [0], [1], [0, 0, 1, 1], [], []>} : vector<128x128xbf16>, vector<128x128xbf16>, vector<128x128xf32> -> vector<128x128xf32>
    %32 = arith.addf %27, %31 : vector<128x128xf32>
    %c0_21 = arith.constant 0 : index
    %c0_22 = arith.constant 0 : index
    %33 = vector.load %arg10[%c0_21, %c0_22] : memref<128x128xf32, #tpu.memory_space<vmem>>, vector<128x128xf32>
    tpu.vector_store %arg10[%c0_21, %c0_22], %32 {strides = array<i32>} : memref<128x128xf32, #tpu.memory_space<vmem>>, vector<128x128xf32>,
    %c0_23 = arith.constant 0 : index
    %c0_24 = arith.constant 0 : index
    %34 = vector.load %arg8[%c0_23, %c0_24] : memref<128x128xf32, #tpu.memory_space<vmem>>, vector<128x128xf32>
    tpu.vector_store %arg8[%c0_23, %c0_24], %14 {strides = array<i32>} : memref<128x128xf32, #tpu.memory_space<vmem>>, vector<128x128xf32>,
    %c0_i32_25 = arith.constant 0 : i32
    %35 = arith.cmpi eq, %arg3, %c0_i32_25 : i32
    %36 = arith.extui %35 : i1 to i32
    %c0_i32_26 = arith.constant 0 : i32
    %37 = arith.cmpi ne, %36, %c0_i32_26 : i32
    scf.if %37 {
      %c0_27 = arith.constant 0 : index
      %c0_28 = arith.constant 0 : index
      %38 = vector.load %arg9[%c0_27, %c0_28] : memref<128x128xf32, #tpu.memory_space<vmem>>, vector<128x128xf32>
      %39 = tpu.reciprocal %38 {approx = true} : vector<128x128xf32> -> vector<128x128xf32>
      %c0_29 = arith.constant 0 : index
      %c0_30 = arith.constant 0 : index
      %40 = vector.load %arg10[%c0_29, %c0_30] : memref<128x128xf32, #tpu.memory_space<vmem>>, vector<128x128xf32>
      %41 = arith.mulf %40, %39 : vector<128x128xf32>
      %42 = arith.truncf %41 : vector<128x128xf32> to vector<128x128xbf16>
      %c0_31 = arith.constant 0 : index
      %c0_32 = arith.constant 0 : index
      %c0_33 = arith.constant 0 : index
      %43 = vector.load %arg7[%c0_31, %c0_32, %c0_33] : memref<1x128x128xbf16, #tpu.memory_space<vmem>>, vector<1x128x128xbf16>
      %44 = vector.shape_cast %43 : vector<1x128x128xbf16> to vector<128x128xbf16>
      %45 = vector.shape_cast %42 : vector<128x128xbf16> to vector<1x128x128xbf16>
      tpu.vector_store %arg7[%c0_31, %c0_32, %c0_33], %45 {strides = array<i32>} : memref<1x128x128xbf16, #tpu.memory_space<vmem>>, vector<1x128x128xbf16>,
    } else {
    }
    return
  }
  func.func @transform_0(%arg0: i32, %arg1: i32, %arg2: i32, %arg3: i32) -> (i32, i32, i32) {
    %c0_i32 = arith.constant 0 : i32
    return %arg0, %arg2, %arg1 : i32, i32, i32
  }
  func.func @transform_1(%arg0: i32, %arg1: i32, %arg2: i32, %arg3: i32) -> (i32, i32, i32) {
    %c2_i32 = arith.constant 2 : i32
    %0 = arith.addi %c2_i32, %arg1 : i32
    %c0_i32 = arith.constant 0 : i32
    return %arg0, %arg3, %0 : i32, i32, i32
  }
  func.func @transform_2(%arg0: i32, %arg1: i32, %arg2: i32, %arg3: i32) -> (i32, i32, i32) {
    %c4_i32 = arith.constant 4 : i32
    %0 = arith.addi %c4_i32, %arg1 : i32
    %c0_i32 = arith.constant 0 : i32
    return %arg0, %arg3, %0 : i32, i32, i32
  }
  func.func @transform_3(%arg0: i32, %arg1: i32, %arg2: i32, %arg3: i32) -> (i32, i32, i32) {
    %c0_i32 = arith.constant 0 : i32
    return %arg0, %arg2, %arg1 : i32, i32, i32
  }
}

</mosaic_0001>

<bundles_post_ra>
// kernel: tpu_custom_call.1
= control target key start
LH: loop header
LB: loop body
LE: loop exit
PB: predicated region body
PF: predicated region fallthrough
CT: control target
= control target key end

     0   :  { %s2842_s0 = inlined_call_operand.hbm [shape: bf16[2,128,768], index: 0, kind: input, shape index: {}]   ;;  %s2843_s1 = inlined_call_operand.hbm [shape: bf16[2,128,768], index: 1, kind: input, shape index: {}]   ;;  %s2844_s2 = inlined_call_operand.hbm [shape: bf16[2,128,768], index: 2, kind: input, shape index: {}]   ;;  %s2845_s3 = inlined_call_operand.hbm [shape: bf16[2,128,256], index: 3, kind: output, shape index: {}]  }
   0x1   :  { %2867 = sst [smem:[#allocation26_spill]] %s2842_s0 }
   0x2   :  { %2868 = sst [smem:[#allocation27_spill]] %s2843_s1 }
   0x3   :  { %2869 = sst [smem:[#allocation28_spill]] %s2845_s3 }
   0x4   :  { %8 = vsyncpa [#allocation6], 0 }
   0x5   :  { %10 = vsyncpa [#allocation6 + $0x1], 0 }
   0x6   :  { %11 = vsyncpa [#allocation9], 0 }
   0x7   :  { %13 = vsyncpa [#allocation9 + $0x1], 0 }
   0x8   :  { %14 = vsyncpa [#allocation7], 0 }
   0x9   :  { %16 = vsyncpa [#allocation7 + $0x1], 0  ;;  %s2175_s12 = smov 0   ;;  %s2177_s13 = smov 0  }
   0xa   :  { %s2179_s14 = smov 0   ;;  %s2181_s15 = smov 0  }
   0xb   :  { %s2183_s16 = smov 0   ;;  %s2185_s17 = smov 0  }
   0xc   :  { %s2187_s18 = smov 0   ;;  %s2189_s19 = smov 0  }
   0xd   :  { %s2191_s20 = smov 0   ;;  %s2193_s21 = smov 0  }
   0xe   :  { %s2195_s22 = smov 0   ;;  %s2197_s23 = smov 0  }
   0xf   :  { %s2199_s24 = smov 0   ;;  %s2201_s25 = smov 0  }
  0x10 LB: > { %2870 = sst [smem:[#allocation16_spill]] %s2107_s16  ;;  %s2246_s26 = sadd.s32 4294967295, %s2143_s25   ;;  %s2143_s25 = sphi %s2201_s25, %s22_s25   ;;  %s2139_s24 = sphi %s2199_s24, %s2923_s24   ;;  %s2135_s23 = sphi %s2197_s23, %s2922_s23   ;;  %s2131_s22 = sphi %s2195_s22, %s2921_s22   ;;  %s2127_s21 = sphi %s2193_s21, %s2920_s21   ;;  %s2123_s20 = sphi %s2191_s20, %s2919_s20   ;;  %s2119_s19 = sphi %s2189_s19, %s2930_s19   ;;  %s2115_s18 = sphi %s2187_s18, %s2929_s18   ;;  %s2111_s17 = sphi %s2185_s17, %s2928_s17   ;;  %s2107_s16 = sphi %s2183_s16, %s2927_s16   ;;  %s2103_s15 = sphi %s2181_s15, %s2917_s15   ;;  %s2099_s14 = sphi %s2179_s14, %s2926_s14   ;;  %s2095_s13 = sphi %s2177_s13, %s2925_s13   ;;  %s2091_s12 = sphi %s2175_s12, %s2924_s12  }
  0x11   : > { %2871 = sst [smem:[#allocation17_spill]] %s2123_s20  ;;  %s44_s27 = sadd.s32 1, %s2135_s23 }
  0x12   : > { %2872 = sst [smem:[#allocation18_spill]] %s2127_s21  ;;  %p46_p0 = scmp.ge.s32.totalorder %s44_s27, 2 }
  0x13   : > { %2873 = sst [smem:[#allocation19_spill]] %s2131_s22  ;;  %s48_s28 = sadd.s32 1, %s2139_s24 }
  0x14   : > { %2874 = sst [smem:[#allocation20_spill]] %s2135_s23  ;;  %p2853_p1 = scmp.eq.s32.totalorder %s2143_s25, 0 }
  0x15   : > { %2875 = sst [smem:[#allocation21_spill]] %s2139_s24  ;;  %p2852_p2 = scmp.eq.s32.totalorder %s2246_s26, 0 }
  0x16   : > { %s2932_s27 = smov (%p46_p0, %s44_s27), 0  ;;  %s2934_s28 = smov (!%p46_p0, %s48_s28), %s2139_s24 }
  0x17   : > { %2876 = sst [smem:[#allocation22_spill]] %s2932_s27  ;;  %s82_s29 = sadd.s32 2, %s2135_s23 }
  0x18   : > { %s83_s30 = sadd.s32 2, %s2932_s27  ;;  %p50_p3 = scmp.ge.s32.totalorder %s2934_s28, 2 }
  0x19   : > { %s87_s4 = ssub.s32 %s82_s29, %s83_s30  ;;  %s91_s5 = sadd.s32 1, %s2111_s17 }
  0x1a   : > { %p98_p4 = scmp.ne.s32.totalorder %s2111_s17, %s2107_s16  ;;  %s2936_s28 = smov (%p50_p3, %s2934_s28), 0 }
  0x1b   : > { %2877 = sst [smem:[#allocation23_spill]] %s2936_s28  ;;  %p104_p6 = scmp.ne.s32.totalorder %s2107_s16, %s2103_s15 }
  0x1c   : > { %p2264_p5 = por %p98_p4, %p2853_p1  ;;  %s2272_s7 = ssub.s32 %s2139_s24, %s2936_s28 }
  0x1d   : > { %s114_s8 = sadd.s32 4, %s2135_s23  ;;  %s88_s9 = sor.u32 %s87_s4, %s2272_s7 }
  0x1e   : > { %p2278_p7 = por %p104_p6, %p2852_p2  ;;  %p89_p8 = scmp.eq.s32.totalorder %s88_s9, 0 }
  0x1f   : > { %s115_s11 = sadd.s32 4, %s2932_s27  ;;  %p2851_p9 = scmp.lt.s32.totalorder %s2143_s25, 4 }
  0x20   : > { %s2879_s10 = scalar_select %p2278_p7, 1, 0 }
  0x21   : > { %s119_s29 = ssub.s32 %s114_s8, %s115_s11  ;;  %s1634_s4 = smul.u32 96, %s2139_s24 }
  0x22   : > { %2880 = sst [smem:[#allocation24_spill]] %s2879_s10  ;;  %s120_s15 = sor.u32 %s119_s29, %s2272_s7 }
  0x23   : > { %s2284_s30 = scalar_select %p89_p8, %s2111_s17, %s91_s5  }
  0x24   : > { %p2288_p10 = scmp.eq.s32.totalorder %s120_s15, 0  ;;  %s202_s3 = sadd.s32 %s2135_s23, %s1634_s4 }
  0x25   : > { %s2294_s21 = sshll.u32 %s202_s3, 6  ;;  %s215_s9 = sand.u32 1, %s2143_s25  }
  0x26   : > { %s217_s22 = sand.u32 1, %s2111_s17   ;;  %s2882_s1 = sld [smem:[#allocation27_spill]] }
  0x27   : > { %s1421_s10 = sshll.u32 %s217_s22, 6  ;;  %p2308_p11 = pnand %p2851_p9, %p2264_p5 }
  0x28   : > { %s219_s29 = scalar_lea.vmem [#allocation8], %s1421_s10  ;;  %s2316_s16 = scalar_lea.sflag [#allocation9], %s215_s9 }
  0x29   : > { %s231_s15 = sshll.u32 %s219_s29, 4  ;;  %p1899_p3 = pneg %p2308_p11  ;;  %s2312_s15 = int_to_ptr.vmem [resolvable:$true] %s231_s15 }
  0x2c   : > { %s1311_s5 = scalar_lea.hbm %s2882_s1, %s2294_s21  ;;  %s1902_s4 = scalar_lea.hbm %s2882_s1, 12288 }
  0x2d   : > { %s2302_s11 = scalar_lea.hbm %s1311_s5, 128  ;;  %s1927_s22 = scalar_lea.hbm %s1311_s5, 1152 }
  0x2e   : > { %p1898_p0 = scmp.ne.s32.totalorder %s2302_s11, %s1927_s22  ;;  %p1903_p5 = scmp.lt.u32.totalorder %s2302_s11, %s2882_s1 }
  0x2f   : > { %p1904_p8 = scmp.lt.u32.totalorder %s1902_s4, %s1927_s22  ;;  %p1906_p2 = scmp.lt.u32.totalorder %s1927_s22, %s2302_s11 }
  0x30   : > { %p1900_p4 = pnand %p1899_p3, %p1898_p0 }
  0x31   : > { %p1905_p9 = por %p1904_p8, %p1903_p5 }
  0x32   : > { %p1901_p6 = pneg %p1900_p4 }
  0x33   : > { %p1907_p1 = por %p1906_p2, %p1905_p9 }
  0x35   : > { %p1908_p12 = pnand %p1907_p1, %p1901_p6 }
  0x37   : > { %1911 = shalt.err (!%p1908_p12)
}
  0x38   : > { %s1912_s9 = scalar_lea.vmem %s2312_s15, 1024  ;;  %s2145_s5 = smov [#allocation8]  }
  0x39   : > { %p1913_p0 = scmp.ne.s32.totalorder %s2312_s15, %s1912_s9  ;;  %s1917_s6 = sshll.u32 %s2145_s5, 4  ;;  %s1918_s6 = int_to_ptr.vmem [resolvable:$false] %s1917_s6 }
  0x3a   : > { %s1919_s10 = scalar_lea.vmem %s1918_s6, 2048  ;;  %p1920_p7 = scmp.lt.s32.totalorder %s2312_s15, %s1918_s6 }
  0x3b   : > { %p1915_p4 = pnand %p1913_p0, %p1899_p3  ;;  %p1921_p5 = scmp.lt.s32.totalorder %s1919_s10, %s1912_s9 }
  0x3d   : > { %p1916_p13 = pneg %p1915_p4  ;;  %p1922_p8 = por %p1921_p5, %p1920_p7 }
  0x3f   : > { %p1923_p2 = pnand %p1922_p8, %p1916_p13 }
  0x41   : > { %1926 = shalt.err (!%p1923_p2)
}
  0x42   : > { %s2855_s22 = smov 384   ;;  %s2857_s4 = smov 64  }
  0x43   : > { %s2859_s8 = smov 4   ;;  %p2884_p1 = scmp.lt.s32.totalorder %s2143_s25, 5 }
  0x44   : > { %1649 = dma.hbm_to_vmem [thread:$0]  (!%p2308_p11), %s2302_s11, 1024, %s2312_s15, %s2316_s16, %s2855_s22, %s2857_s4, %s2859_s8  }
  0x45   : > { %p2885_p7 = scmp.ge.s32.totalorder %s2143_s25, 1  ;;  %s1416_s9 = sadd.s32 4294967294, %s2143_s25  }
  0x46   : > { %s55_s5 = ssub.s32 %s2135_s23, %s2932_s27  ;;  %s59_s6 = sadd.s32 1, %s2123_s20 }
  0x47   : > { %p2350_p9 = pnand %p2885_p7, %p2884_p1  ;;  %s56_s10 = sor.u32 %s55_s5, %s2272_s7 }
  0x48   : > { %p66_p12 = scmp.ne.s32.totalorder %s2123_s20, %s2119_s19  ;;  %p57_p13 = scmp.eq.s32.totalorder %s56_s10, 0 }
  0x49   : > { %s2886_s29 = scalar_select %p2350_p9, 1, 0 }
  0x4a   : > { %p72_p3 = scmp.ne.s32.totalorder %s2119_s19, %s2115_s18  ;;  %p2887_p6 = scmp.eq.s32.totalorder %s2143_s25, 0 }
  0x4b   : > { %p164_p11 = scmp.eq.s32.totalorder %s2246_s26, 3  ;;  %p2890_p4 = scmp.eq.s32.totalorder %s2246_s26, 0 }
  0x4c   : > { %p2365_p0 = por %p2887_p6, %p66_p12  ;;  %p170_p2 = scmp.eq.s32.totalorder %s1416_s9, 3 }
  0x4d   : > { %s2371_s11 = scalar_select %p57_p13, %s2123_s20, %s59_s6  }
  0x4e   : > { %p2375_p5 = por %p2890_p4, %p72_p3  ;;  %p2379_p8 = por %p164_p11, %p66_p12 }
  0x4f   : > { %2889 = sst [smem:[#allocation25_spill]] %s2371_s11  ;;  %s190_s5 = sand.u32 1, %s2123_s20  }
  0x50   : > { %s2891_s15 = scalar_select %p2375_p5, 1, 0 }
  0x51   : > { %s2892_s7 = scalar_select %p2379_p8, 1, 0 }
  0x52   : > { %s1419_s10 = sshll.u32 %s190_s5, 6  ;;  %p2384_p1 = por %p170_p2, %p72_p3 }
  0x53   : > { %s2894_s0 = sld [smem:[#allocation26_spill]]  ;;  %s194_s1 = scalar_lea.vmem [#allocation5], %s1419_s10 }
  0x54   : > { %s2893_s22 = scalar_select %p2384_p1, 1, 0 }
  0x55   : > { %s205_s27 = sshll.u32 %s194_s1, 4  ;;  %p2895_p7 = scmp.lt.s32.totalorder %s2143_s25, 4  ;;  %s2394_s27 = int_to_ptr.vmem [resolvable:$true] %s205_s27 }
  0x56   : > { %s2404_s24 = scalar_lea.sflag [#allocation6], %s190_s5 }
  0x57   : > { %p2400_p12 = pnand %p2895_p7, %p2365_p0 }
  0x59   : > { %s2392_s6 = scalar_lea.hbm %s2894_s0, %s2294_s21  ;;  %p1930_p3 = pneg %p2400_p12 }
  0x5a   : > { %s1928_s4 = scalar_lea.hbm %s2392_s6, 1024  ;;  %s1933_s3 = scalar_lea.hbm %s2894_s0, 12288 }
  0x5b   : > { %p1929_p13 = scmp.ne.s32.totalorder %s2392_s6, %s1928_s4  ;;  %p1934_p0 = scmp.lt.u32.totalorder %s2392_s6, %s2894_s0 }
  0x5c   : > { %p1935_p4 = scmp.lt.u32.totalorder %s1933_s3, %s1928_s4  ;;  %p1937_p7 = scmp.lt.u32.totalorder %s1928_s4, %s2392_s6 }
  0x5d   : > { %p1931_p6 = pnand %p1930_p3, %p1929_p13 }
  0x5e   : > { %p1936_p2 = por %p1935_p4, %p1934_p0 }
  0x5f   : > { %p1932_p11 = pneg %p1931_p6 }
  0x60   : > { %p1938_p1 = por %p1937_p7, %p1936_p2 }
  0x62   : > { %p1939_p8 = pnand %p1938_p1, %p1932_p11 }
  0x64   : > { %1942 = shalt.err (!%p1939_p8)
}
  0x65   : > { %s1943_s5 = scalar_lea.vmem %s2394_s27, 1024  ;;  %s2149_s1 = smov [#allocation5]  }
  0x66   : > { %p1944_p13 = scmp.ne.s32.totalorder %s2394_s27, %s1943_s5  ;;  %s1948_s8 = sshll.u32 %s2149_s1, 4  ;;  %s1949_s8 = int_to_ptr.vmem [resolvable:$false] %s1948_s8 }
  0x67   : > { %s1950_s23 = scalar_lea.vmem %s1949_s8, 2048  ;;  %p1951_p9 = scmp.lt.s32.totalorder %s2394_s27, %s1949_s8 }
  0x68   : > { %p1946_p6 = pnand %p1944_p13, %p1930_p3  ;;  %p1952_p0 = scmp.lt.s32.totalorder %s1950_s23, %s1943_s5 }
  0x6a   : > { %p1947_p5 = pneg %p1946_p6  ;;  %p1953_p4 = por %p1952_p0, %p1951_p9 }
  0x6c   : > { %p1954_p2 = pnand %p1953_p4, %p1947_p5 }
  0x6e   : > { %1957 = shalt.err (!%p1954_p2)
}
  0x6f   : > { %s2897_s4 = smov 4   ;;  %s2898_s3 = smov 64  }
  0x70   : > { %s2899_s10 = smov 384   ;;  %s123_s9 = sadd.s32 1, %s2099_s14 }
  0x71   : > { %1646 = dma.hbm_to_vmem [thread:$0]  (!%p2400_p12), %s2392_s6, 1024, %s2394_s27, %s2404_s24, %s2899_s10, %s2898_s3, %s2897_s4  }
  0x72   : > { %s2439_s5 = scalar_select %p2288_p10, %s2099_s14, %s123_s9  }
  0x73   : > { %p130_p9 = scmp.ne.s32.totalorder %s2099_s14, %s2095_s13  ;;  %p136_p5 = scmp.ne.s32.totalorder %s2095_s13, %s2091_s12 }
  0x74   : > { %s243_s1 = sand.u32 1, %s2099_s14   ;;  %s1321_s0 = scalar_lea.hbm %s2844_s2, %s2294_s21 }
  0x75   : > { %p2900_p8 = scmp.eq.s32.totalorder %s2143_s25, 0  ;;  %p2901_p3 = scmp.eq.s32.totalorder %s2246_s26, 0 }
  0x76   : > { %s1423_s20 = sshll.u32 %s243_s1, 6  ;;  %s2458_s24 = scalar_lea.hbm %s1321_s0, 256 }
  0x77   : > { %p132_p1 = por %p130_p9, %p2900_p8  ;;  %p2454_p11 = por %p136_p5, %p2901_p3 }
  0x78   : > { %p2903_p12 = scmp.lt.s32.totalorder %s2143_s25, 4  ;;  %s245_s21 = scalar_lea.vmem [#allocation10], %s1423_s20 }
  0x79   : > { %s257_s27 = sshll.u32 %s245_s21, 4  ;;  %s1988_s28 = scalar_lea.hbm %s1321_s0, 1280  ;;  %s2466_s27 = int_to_ptr.vmem [resolvable:$true] %s257_s27 }
  0x7a   : > { %p2462_p10 = pnand %p2903_p12, %p132_p1  ;;  %p1959_p7 = scmp.ne.s32.totalorder %s2458_s24, %s1988_s28 }
  0x7b   : > { %s1963_s1 = scalar_lea.hbm %s2844_s2, 12288  ;;  %p1964_p4 = scmp.lt.u32.totalorder %s2458_s24, %s2844_s2 }
  0x7c   : > { %p1960_p13 = pneg %p2462_p10  ;;  %p1965_p2 = scmp.lt.u32.totalorder %s1963_s1, %s1988_s28 }
  0x7d   : > { %p1967_p5 = scmp.lt.u32.totalorder %s1988_s28, %s2458_s24 }
  0x7e   : > { %p1961_p6 = pnand %p1960_p13, %p1959_p7  ;;  %p1966_p9 = por %p1965_p2, %p1964_p4 }
  0x80   : > { %p1962_p0 = pneg %p1961_p6  ;;  %p1968_p8 = por %p1967_p5, %p1966_p9 }
  0x82   : > { %p1969_p1 = pnand %p1968_p8, %p1962_p0 }
  0x84   : > { %1972 = shalt.err (!%p1969_p1)
}
  0x85   : > { %s1973_s0 = scalar_lea.vmem %s2466_s27, 1024  ;;  %s2150_s20 = smov [#allocation10]  }
  0x86   : > { %p1974_p3 = scmp.ne.s32.totalorder %s2466_s27, %s1973_s0  ;;  %s1978_s21 = sshll.u32 %s2150_s20, 4  ;;  %s1979_s21 = int_to_ptr.vmem [resolvable:$false] %s1978_s21 }
  0x87   : > { %s1980_s6 = scalar_lea.vmem %s1979_s21, 2048  ;;  %p1981_p6 = scmp.lt.s32.totalorder %s2466_s27, %s1979_s21 }
  0x88   : > { %p1976_p12 = pnand %p1974_p3, %p1960_p13  ;;  %p1982_p4 = scmp.lt.s32.totalorder %s1980_s6, %s1973_s0 }
  0x8a   : > { %p1977_p7 = pneg %p1976_p12  ;;  %p1983_p2 = por %p1982_p4, %p1981_p6 }
  0x8c   : > { %p1984_p9 = pnand %p1983_p2, %p1977_p7 }
  0x8e   : > { %1987 = shalt.err (!%p1984_p9)
}
  0x8f   : > { %1652 = dma.hbm_to_vmem [thread:$0]  (!%p2462_p10), %s2458_s24, 1024, %s2466_s27, %s2316_s16, %s2899_s10, %s2898_s3, %s2897_s4  }
  0x90   : > { %p2905_p13 = scmp.ne.s32.totalorder %s2886_s29, 0 }
  0x91   : > { %s2499_s28 = sand.u32 (!%p2905_p13), 1, %s2119_s19   ;;  %p2906_p0 = scmp.ne.s32.totalorder (!%p2905_p13), %s2891_s15, 0 }
  0x92   : > { %269 = sbr.rel (%p2905_p13) target bundleno = 874 (0x36a), region = 32  ;;  %s1426_s9 = sshll.u32 (!%p2905_p13), %s2499_s28, 6 }
  0x93   : > { %s272_s1 = scalar_lea.sflag (!%p2905_p13), [#allocation6], %s2499_s28  ;;  %s2505_s12 = scalar_lea.vmem (!%p2905_p13), [#allocation5], %s1426_s9 }
  0x99   : > { %2074 = dma.done.wait (%p2906_p0), %s272_s1, 1024  }
  0x9a   : > { %2076 = vsyncadd (%p2906_p0), %s272_s1, 4294966272  ;;  %s2907_s16 = sld [smem:[#allocation16_spill]]  ;;  %s2908_s29 = sld [smem:[#allocation24_spill]] }
  0x9b   : > { %s280_s4 = sand.u32 1, %s2246_s26  }
  0x9c   : > { %s281_s24 = scalar_lea.sflag [#allocation9], %s280_s4 }
  0xa0   : > { %s282_s3 = sand.u32 1, %s2907_s16   ;;  %p2909_p10 = scmp.ne.s32.totalorder %s2908_s29, 0 }
  0xa1   : > { %s1427_s10 = sshll.u32 %s282_s3, 6 }
  0xa2   : > { %s284_s27 = scalar_lea.vmem [#allocation8], %s1427_s10 }
  0xa3   : > { %2078 = dma.done.wait (%p2909_p10), %s281_s24, 1024  }
  0xa4   : > { %2080 = vsyncadd (%p2909_p10), %s281_s24, 4294966272  ;;  %s291_s8 = sand.u32 1, %s2095_s13  }
  0xa5   : > { %s1428_s23 = sshll.u32 %s291_s8, 6 }
  0xa6   : > { %s2518_s0 = scalar_lea.vmem [#allocation10], %s1428_s23 }
  0xa7   : > { %2082 = dma.done.wait (%p2454_p11), %s281_s24, 1024  }
  0xa8   : > { %2084 = vsyncadd (%p2454_p11), %s281_s24, 4294966272  ;;  %v1777_v0 = vld [vmem:[%s284_s27] sm:$0xff]   ;;  %v1778_v1 = vld [vmem:[%s284_s27 + $0x8] sm:$0xff]   ;;  %s2739_s26 = scalar_lea.vmem [#allocation11], %s1426_s9  ;;  %s2910_s11 = sld [smem:[#allocation19_spill]] }
  0xa9   : > { %1570 = vmatprep.subr.bf16.mxu0 %v1777_v0  ;;  %v1779_v2 = vld [vmem:[%s284_s27 + $0x10] sm:$0xff]   ;;  %v1785_v3 = vld [vmem:[%s2505_s12] sm:$0xff]   ;;  %v1780_v4 = vld [vmem:[%s284_s27 + $0x18] sm:$0xff]   ;;  %s2911_s15 = sld [smem:[#allocation18_spill]]  ;;  %s1264_s6 = sshll.u32 %s2739_s26, 4  ;;  %s2757_s6 = int_to_ptr.vmem [resolvable:$true] %s1264_s6 }
  0xaa   : > { %1571 = vmatpush3.bf16.xpose.msra.mxu0 %v1777_v0  ;;  %1586 = vmatprep.mubr.bf16.mxu0 %v1785_v3  ;;  %v1781_v5 = vld [vmem:[%s284_s27 + $0x20] sm:$0xff]   ;;  %v1782_v6 = vld [vmem:[%s284_s27 + $0x28] sm:$0xff]   ;;  %v1783_v7 = vld [vmem:[%s284_s27 + $0x30] sm:$0xff]   ;;  %s2912_s16 = sld [smem:[#allocation28_spill]]  ;;  %s1247_s3 = scalar_lea.sflag [#allocation7], %s2499_s28 }
  0xab   : > { %1572 = vmatprep.subr.bf16.mxu0 %v1778_v1  ;;  %v1784_v8 = vld [vmem:[%s284_s27 + $0x38] sm:$0xff]   ;;  %v1786_v9 = vld [vmem:[%s2505_s12 + $0x8] sm:$0xff]   ;;  %v1787_v10 = vld [vmem:[%s2505_s12 + $0x10] sm:$0xff]   ;;  %s1989_s10 = scalar_lea.vmem %s2757_s6, 1024  ;;  %p2914_p5 = scmp.ne.s32.totalorder %s2892_s7, 0 }
  0xac   : > { %v1788_v11 = vld [vmem:[%s2505_s12 + $0x18] sm:$0xff]   ;;  %v1789_v12 = vld [vmem:[%s2505_s12 + $0x20] sm:$0xff]   ;;  %v1790_v13 = vld [vmem:[%s2505_s12 + $0x28] sm:$0xff]   ;;  %p1990_p11 = scmp.ne.s32.totalorder %s2757_s6, %s1989_s10  ;;  %s2151_s24 = smov [#allocation11]  }
  0xad   : > { %v1791_v14 = vld [vmem:[%s2505_s12 + $0x30] sm:$0xff]   ;;  %v1792_v15 = vld [vmem:[%s2505_s12 + $0x38] sm:$0xff]   ;;  %v1793_v16 = vld [vmem:[%s2518_s0] sm:$0xff]   ;;  %s1993_s27 = sshll.u32 %s2151_s24, 4  ;;  %s1994_s27 = int_to_ptr.vmem [resolvable:$false] %s1993_s27 }
  0xae   : > { %v1794_v17 = vld [vmem:[%s2518_s0 + $0x8] sm:$0xff]   ;;  %1602 = vmatprep.subr.bf16.mxu1 %v1793_v16  ;;  %v1795_v18 = vld [vmem:[%s2518_s0 + $0x10] sm:$0xff]   ;;  %v1796_v41 = vld [vmem:[%s2518_s0 + $0x18] sm:$0xff]   ;;  %s1471_s20 = sshll.u32 %s2910_s11, 5  ;;  %p1991_p8 = pnand %p1990_p11, %p2914_p5 }
  0xaf   : > { %1603 = vmatpush3.bf16.msra.mxu1 %v1793_v16  ;;  %v1797_v45 = vld [vmem:[%s2518_s0 + $0x20] sm:$0xff]   ;;  %v1798_v51 = vld [vmem:[%s2518_s0 + $0x28] sm:$0xff]   ;;  %v1799_v54 = vld [vmem:[%s2518_s0 + $0x30] sm:$0xff]   ;;  %s1261_s21 = sadd.s32 %s2911_s15, %s1471_s20  ;;  %s1995_s8 = scalar_lea.vmem %s1994_s27, 2048 }
  0xb0   : > { %1604 = vmatprep.subr.bf16.mxu1 %v1794_v17  ;;  %v1800_v55 = vld [vmem:[%s2518_s0 + $0x38] sm:$0xff]   ;;  %s1472_s9 = sshll.u32 %s1261_s21, 6  ;;  %s2913_s29 = smov %s2912_s16 }
  0xb1   : > { %s2762_s4 = scalar_lea.hbm %s2912_s16, %s1472_s9  ;;  %p1992_p1 = pneg %p1991_p8 }
  0xb2   : > { %1573 = vmatpush3.bf16.xpose.msra.mxu0 %v1778_v1  ;;  %p1996_p3 = scmp.lt.s32.totalorder %s2757_s6, %s1994_s27  ;;  %p1997_p12 = scmp.lt.s32.totalorder %s1995_s8, %s1989_s10 }
  0xb3   : > { %1574 = vmatprep.subr.bf16.mxu0 %v1779_v2  ;;  %1605 = vmatpush3.bf16.msra.mxu1 %v1794_v17 }
  0xb4   : > { %1606 = vmatprep.subr.bf16.mxu1 %v1795_v18  ;;  %p1998_p7 = por %p1997_p12, %p1996_p3 }
  0xb6   : > { %p1999_p6 = pnand %p1998_p7, %p1992_p1 }
  0xb7   : > { %1607 = vmatpush3.bf16.msra.mxu1 %v1795_v18 }
  0xb8   : > { %1608 = vmatprep.subr.bf16.mxu1 %v1796_v41 }
  0xba   : > { %1575 = vmatpush3.bf16.xpose.msra.mxu0 %v1779_v2 }
  0xbb   : > { %1576 = vmatprep.subr.bf16.mxu0 %v1780_v4  ;;  %1609 = vmatpush3.bf16.msra.mxu1 %v1796_v41 }
  0xbc   : > { %1610 = vmatprep.subr.bf16.mxu1 %v1797_v45 }
  0xbf   : > { %1611 = vmatpush3.bf16.msra.mxu1 %v1797_v45 }
  0xc0   : > { %1612 = vmatprep.subr.bf16.mxu1 %v1798_v51 }
  0xc2   : > { %1577 = vmatpush3.bf16.xpose.msra.mxu0 %v1780_v4 }
  0xc3   : > { %1578 = vmatprep.subr.bf16.mxu0 %v1781_v5  ;;  %1613 = vmatpush3.bf16.msra.mxu1 %v1798_v51 }
  0xc4   : > { %1614 = vmatprep.subr.bf16.mxu1 %v1799_v54 }
  0xc7   : > { %1615 = vmatpush3.bf16.msra.mxu1 %v1799_v54 }
  0xc8   : > { %1616 = vmatprep.subr.bf16.mxu1 %v1800_v55 }
  0xca   : > { %1579 = vmatpush3.bf16.xpose.msra.mxu0 %v1781_v5 }
  0xcb   : > { %1580 = vmatprep.subr.bf16.mxu0 %v1782_v6  ;;  %1617 = vmatpush3.bf16.msra.mxu1 %v1800_v55 }
  0xd2   : > { %1581 = vmatpush3.bf16.xpose.msra.mxu0 %v1782_v6 }
  0xd3   : > { %1582 = vmatprep.subr.bf16.mxu0 %v1783_v7 }
  0xda   : > { %1583 = vmatpush3.bf16.xpose.msra.mxu0 %v1783_v7 }
  0xdb   : > { %1584 = vmatprep.subr.bf16.mxu0 %v1784_v8 }
  0xe2   : > { %1585 = vmatpush3.bf16.xpose.msra.mxu0 %v1784_v8 }
  0xe9   : > { %1587 = vmatmul.mubr.bf16.vlgmr.msra.gmra.mrb[0].mxu0 %v1786_v9 }
  0xea   : > { %1590 = vmatprep.mubr.bf16.mxu0 %v1787_v10 }
  0xf1   : > { %1591 = vmatmul.mubr.bf16.gmra.mrb[4].mxu0 %v1788_v11 }
  0xf2   : > { %1594 = vmatprep.mubr.bf16.mxu0 %v1789_v12 }
  0xf9   : > { %1595 = vmatmul.mubr.bf16.gmra.mrb[8].mxu0 %v1790_v13 }
  0xfa   : > { %1598 = vmatprep.mubr.bf16.mxu0 %v1791_v14 }
 0x101   : > { %1599 = vmatmul.mubr.bf16.gmra.mrb[12].mxu0 %v1792_v15 }
 0x1bc   : > { %v1588_v19 = vpop.f32.mrb[0].mxu0 }
 0x1bd   : > { %v2535_v20 = vmul.f32 0.12751743, %v1588_v19  ;;  %v547_v21 = vpop.f32.mrb[1].mxu0 }
 0x1be   : > { %v2537_v22 = vmul.f32 0.12751743, %v547_v21  ;;  %v1589_v23 = vpop.f32.mrb[2].mxu0 }
 0x1bf   : > { %646 = vmax.xlane.f32.xlu1 %v2535_v20  ;;  %v550_v24 = vpop.f32.mrb[3].mxu0  ;;  %v2541_v25 = vmul.f32 0.12751743, %v1589_v23 }
 0x1c0   : > { %642 = vmax.xlane.f32.xlu0 %v2537_v22  ;;  %v2543_v26 = vmul.f32 0.12751743, %v550_v24 }
 0x1c3   : > { %648 = vmax.xlane.f32.xlu1 %v2541_v25 }
 0x1c4   : > { %644 = vmax.xlane.f32.xlu0 %v2543_v26  ;;  %v1592_v27 = vpop.f32.mrb[4].mxu0 }
 0x1c5   : > { %v563_v28 = vpop.f32.mrb[5].mxu0  ;;  %v2552_v33 = vmul.f32 0.12751743, %v1592_v27 }
 0x1c6   : > { %v2547_v29 = vmul.f32 0.12751743, %v563_v28  ;;  %v1593_v30 = vpop.f32.mrb[6].mxu0 }
 0x1c7   : > { %v566_v31 = vpop.f32.mrb[7].mxu0  ;;  %v2555_v34 = vmul.f32 0.12751743, %v1593_v30 }
 0x1c8   : > { %v2549_v32 = vmul.f32 0.12751743, %v566_v31  ;;  %650 = vmax.xlane.f32.xlu0 %v2547_v29 }
 0x1ca   : > { %652 = vmax.xlane.f32.xlu1 %v2549_v32 }
 0x1cc   : > { %654 = vmax.xlane.f32.xlu0 %v2552_v33  ;;  %v1596_v35 = vpop.f32.mrb[8].mxu0 }
 0x1cd   : > { %v579_v36 = vpop.f32.mrb[9].mxu0  ;;  %v2565_v42 = vmul.f32 0.12751743, %v1596_v35 }
 0x1ce   : > { %v2558_v37 = vmul.f32 0.12751743, %v579_v36  ;;  %656 = vmax.xlane.f32.xlu1 %v2555_v34  ;;  %v1597_v38 = vpop.f32.mrb[10].mxu0 }
 0x1cf   : > { %v582_v39 = vpop.f32.mrb[11].mxu0  ;;  %v2568_v43 = vmul.f32 0.12751743, %v1597_v38 }
 0x1d0   : > { %v2561_v40 = vmul.f32 0.12751743, %v582_v39  ;;  %658 = vmax.xlane.f32.xlu0 %v2558_v37 }
 0x1d2   : > { %660 = vmax.xlane.f32.xlu1 %v2561_v40 }
 0x1d4   : > { %662 = vmax.xlane.f32.xlu0 %v2565_v42  ;;  %v1600_v44 = vpop.f32.mrb[12].mxu0 }
 0x1d5   : > { %v595_v46 = vpop.f32.mrb[13].mxu0  ;;  %v2579_v52 = vmul.f32 0.12751743, %v1600_v44 }
 0x1d6   : > { %v2572_v47 = vmul.f32 0.12751743, %v595_v46  ;;  %664 = vmax.xlane.f32.xlu1 %v2568_v43  ;;  %v1601_v48 = vpop.f32.mrb[14].mxu0 }
 0x1d7   : > { %v598_v49 = vpop.f32.mrb[15].mxu0  ;;  %v2582_v53 = vmul.f32 0.12751743, %v1601_v48 }
 0x1d8   : > { %v2575_v50 = vmul.f32 0.12751743, %v598_v49  ;;  %666 = vmax.xlane.f32.xlu0 %v2572_v47 }
 0x1da   : > { %668 = vmax.xlane.f32.xlu1 %v2575_v50 }
 0x1dc   : > { %670 = vmax.xlane.f32.xlu0 %v2579_v52 }
 0x1de   : > { %672 = vmax.xlane.f32.xlu1 %v2582_v53 }
 0x24c   : > { %v2588_v56 = vpop.xlane.xlu1 %646 }
 0x24d   : > { %v676_v57 = vmax.f32 %v2588_v56, -2.3819763e+38  ;;  %v2591_v58 = vpop.xlane.xlu0 %642 }
 0x24e   : > { %v674_v59 = vmax.f32 %v2591_v58, -2.3819763e+38 }
 0x24f   : > { %v724_v60 = vsub.f32 %v2535_v20, %v676_v57 }
 0x250   : > { %v2597_v61 = vpop.xlane.xlu1 %648  ;;  %v722_v62 = vsub.f32 %v2537_v22, %v674_v59 }
 0x251   : > { %v677_v63 = vmax.f32 %v2597_v61, -2.3819763e+38  ;;  %v2603_v0 = vpop.xlane.xlu0 %644  ;;  %1801 = vpow2.f32 %v724_v60 }
 0x252   : > { %v675_v1 = vmax.f32 %v2603_v0, -2.3819763e+38  ;;  %1803 = vpow2.f32 %v722_v62 }
 0x253   : > { %v725_v2 = vsub.f32 %v2541_v25, %v677_v63 }
 0x254   : > { %v723_v3 = vsub.f32 %v2543_v26, %v675_v1 }
 0x255   : > { %v2612_v4 = vpop.xlane.xlu0 %650  ;;  %1805 = vpow2.f32 %v725_v2 }
 0x256   : > { %v678_v5 = vmax.f32 %v2612_v4, -2.3819763e+38  ;;  %1807 = vpow2.f32 %v723_v3 }
 0x257   : > { %v2615_v6 = vpop.xlane.xlu1 %652 }
 0x258   : > { %v679_v7 = vmax.f32 %v2615_v6, -2.3819763e+38  ;;  %v726_v9 = vsub.f32 %v2547_v29, %v678_v5  ;;  %v694_v58 = vsub.f32 -2.3819763e+38, %v678_v5 }
 0x259   : > { %v2618_v8 = vpop.xlane.xlu0 %654 }
 0x25a   : > { %v727_v10 = vsub.f32 %v2549_v32, %v679_v7  ;;  %v680_v11 = vmax.f32 %v2618_v8, -2.3819763e+38 }
 0x25b   : > { %v2627_v12 = vpop.xlane.xlu1 %656  ;;  %v1802_v13 = vpop.eup %1801 }
 0x25c   : > { %v728_v14 = vsub.f32 %v2552_v33, %v680_v11  ;;  %v681_v15 = vmax.f32 %v2627_v12, -2.3819763e+38  ;;  %1809 = vpow2.f32 %v727_v10  ;;  %790 = vadd.xlane.f32.xlu0 %v1802_v13  ;;  %v1804_v19 = vpop.eup %1803  ;;  %v696_v56 = vsub.f32 -2.3819763e+38, %v680_v11 }
 0x25d   : > { %v2633_v16 = vpop.xlane.xlu0 %658  ;;  %1811 = vpow2.f32 %v726_v9 }
 0x25e   : > { %v729_v17 = vsub.f32 %v2555_v34, %v681_v15  ;;  %v682_v18 = vmax.f32 %v2633_v16, -2.3819763e+38  ;;  %1813 = vpow2.f32 %v728_v14 }
 0x25f   : > { %v2639_v20 = vpop.xlane.xlu1 %660  ;;  %v1806_v21 = vpop.eup %1805 }
 0x260   : > { %v730_v22 = vsub.f32 %v2558_v37, %v682_v18  ;;  %v683_v23 = vmax.f32 %v2639_v20, -2.3819763e+38  ;;  %1815 = vpow2.f32 %v729_v17  ;;  %786 = vadd.xlane.f32.xlu0 %v1804_v19  ;;  %792 = vadd.xlane.f32.xlu1 %v1806_v21  ;;  %v1808_v25 = vpop.eup %1807  ;;  %v883_v32 = vpack.c.bf16 %v1806_v21, %v1802_v13 }
 0x261   : > { %v2645_v24 = vpop.xlane.xlu0 %662  ;;  %v882_v28 = vpack.c.bf16 %v1808_v25, %v1804_v19  ;;  %v692_v17 = vsub.f32 -2.3819763e+38, %v676_v57  ;;  %v690_v19 = vsub.f32 -2.3819763e+38, %v674_v59  ;;  %v697_v59 = vsub.f32 -2.3819763e+38, %v681_v15 }
 0x262   : > { %v731_v26 = vsub.f32 %v2561_v40, %v683_v23  ;;  %v684_v27 = vmax.f32 %v2645_v24, -2.3819763e+38  ;;  %1817 = vpow2.f32 %v730_v22  ;;  %v693_v22 = vsub.f32 -2.3819763e+38, %v677_v63 }
 0x263   : > { %v2651_v29 = vpop.xlane.xlu1 %664  ;;  %1618 = vmatprep.mubr.bf16.mxu1 %v882_v28  ;;  %v695_v63 = vsub.f32 -2.3819763e+38, %v679_v7  ;;  %v698_v8 = vsub.f32 -2.3819763e+38, %v682_v18  ;;  %v699_v4 = vsub.f32 -2.3819763e+38, %v683_v23 }
 0x264   : > { %v732_v30 = vsub.f32 %v2565_v42, %v684_v27  ;;  %v685_v31 = vmax.f32 %v2651_v29, -2.3819763e+38  ;;  %1819 = vpow2.f32 %v731_v26  ;;  %788 = vadd.xlane.f32.xlu1 %v1808_v25  ;;  %1619 = vmatmul.mubr.bf16.vlgmr.msra.gmra.mrb[0].mxu1 %v883_v32  ;;  %v691_v25 = vsub.f32 -2.3819763e+38, %v675_v1 }
 0x265   : > { %v2657_v33 = vpop.xlane.xlu0 %666  ;;  %v700_v12 = vsub.f32 -2.3819763e+38, %v684_v27 }
 0x266   : > { %v733_v34 = vsub.f32 %v2568_v43, %v685_v31  ;;  %v686_v35 = vmax.f32 %v2657_v33, -2.3819763e+38  ;;  %v1810_v36 = vpop.eup %1809  ;;  %1821 = vpow2.f32 %v732_v30  ;;  %v701_v15 = vsub.f32 -2.3819763e+38, %v685_v31 }
 0x267   : > { %v2663_v37 = vpop.xlane.xlu1 %668  ;;  %v1812_v38 = vpop.eup %1811 }
 0x268   : > { %v734_v39 = vsub.f32 %v2572_v47, %v686_v35  ;;  %v687_v40 = vmax.f32 %v2663_v37, -2.3819763e+38  ;;  %v1814_v41 = vpop.eup %1813  ;;  %1823 = vpow2.f32 %v733_v34  ;;  %v884_v42 = vpack.c.bf16 %v1810_v36, %v1812_v38 }
 0x269   : > { %v2669_v44 = vpop.xlane.xlu0 %670  ;;  %798 = vadd.xlane.f32.xlu0 %v1814_v41  ;;  %v702_v29 = vsub.f32 -2.3819763e+38, %v686_v35 }
 0x26a   : > { %v735_v43 = vsub.f32 %v2575_v50, %v687_v40  ;;  %v688_v45 = vmax.f32 %v2669_v44, -2.3819763e+38  ;;  %v1816_v46 = vpop.eup %1815  ;;  %1622 = vmatprep.mubr.bf16.mxu1 %v884_v42  ;;  %1825 = vpow2.f32 %v734_v39 }
 0x26b   : > { %v2675_v48 = vpop.xlane.xlu1 %672  ;;  %800 = vadd.xlane.f32.xlu1 %v1816_v46  ;;  %v885_v51 = vpack.c.bf16 %v1816_v46, %v1814_v41  ;;  %v703_v46 = vsub.f32 -2.3819763e+38, %v687_v40 }
 0x26c   : > { %v736_v47 = vsub.f32 %v2579_v52, %v688_v45  ;;  %v689_v49 = vmax.f32 %v2675_v48, -2.3819763e+38  ;;  %1827 = vpow2.f32 %v735_v43  ;;  %v1818_v54 = vpop.eup %1817  ;;  %v704_v41 = vsub.f32 -2.3819763e+38, %v688_v45 }
 0x26d   : > { %794 = vadd.xlane.f32.xlu0 %v1812_v38  ;;  %1623 = vmatmul.mubr.bf16.gmra.mrb[4].mxu1 %v885_v51 }
 0x26e   : > { %v737_v50 = vsub.f32 %v2582_v53, %v689_v49  ;;  %v1820_v55 = vpop.eup %1819  ;;  %1829 = vpow2.f32 %v736_v47  ;;  %v705_v51 = vsub.f32 -2.3819763e+38, %v689_v49 }
 0x26f   : > { %796 = vadd.xlane.f32.xlu1 %v1810_v36  ;;  %v886_v60 = vpack.c.bf16 %v1820_v55, %v1818_v54 }
 0x270   : > { %v1822_v62 = vpop.eup %1821  ;;  %1831 = vpow2.f32 %v737_v50 }
 0x271   : > { %1626 = vmatprep.mubr.bf16.mxu1 %v886_v60  ;;  %806 = vadd.xlane.f32.xlu0 %v1822_v62  ;;  %1833 = vpow2.f32 %v692_v17 }
 0x272   : > { %v1824_v52 = vpop.eup %1823  ;;  %1835 = vpow2.f32 %v690_v19 }
 0x273   : > { %808 = vadd.xlane.f32.xlu1 %v1824_v52  ;;  %v887_v2 = vpack.c.bf16 %v1824_v52, %v1822_v62  ;;  %1837 = vpow2.f32 %v693_v22 }
 0x274   : > { %v1826_v3 = vpop.eup %1825  ;;  %1839 = vpow2.f32 %v691_v25 }
 0x275   : > { %802 = vadd.xlane.f32.xlu0 %v1818_v54  ;;  %1627 = vmatmul.mubr.bf16.gmra.mrb[8].mxu1 %v887_v2  ;;  %1841 = vpow2.f32 %v696_v56 }
 0x276   : > { %v1828_v9 = vpop.eup %1827  ;;  %1843 = vpow2.f32 %v694_v58 }
 0x277   : > { %804 = vadd.xlane.f32.xlu1 %v1820_v55  ;;  %v888_v10 = vpack.c.bf16 %v1828_v9, %v1826_v3  ;;  %1845 = vpow2.f32 %v697_v59 }
 0x278   : > { %v1830_v53 = vpop.eup %1829  ;;  %1847 = vpow2.f32 %v695_v63 }
 0x279   : > { %810 = vadd.xlane.f32.xlu0 %v1826_v3  ;;  %1630 = vmatprep.mubr.bf16.mxu1 %v888_v10  ;;  %1849 = vpow2.f32 %v698_v8 }
 0x27a   : > { %v1832_v13 = vpop.eup %1831  ;;  %1851 = vpow2.f32 %v699_v4 }
 0x27b   : > { %812 = vadd.xlane.f32.xlu1 %v1828_v9  ;;  %v889_v14 = vpack.c.bf16 %v1832_v13, %v1830_v53  ;;  %v1834_v1 = vpop.eup %1833  ;;  %1853 = vpow2.f32 %v700_v12 }
 0x27c   : > { %v1836_v30 = vpop.eup %1835  ;;  %v772_v6 = vmul.f32 0.0, %v1834_v1  ;;  %1855 = vpow2.f32 %v701_v15 }
 0x27d   : > { %814 = vadd.xlane.f32.xlu0 %v1830_v53  ;;  %1631 = vmatmul.mubr.bf16.gmra.mrb[12].mxu1 %v889_v14  ;;  %v1838_v11 = vpop.eup %1837  ;;  %v770_v32 = vmul.f32 0.0, %v1836_v30 }
 0x27e   : > { %v1840_v5 = vpop.eup %1839  ;;  %v773_v36 = vmul.f32 0.0, %v1838_v11 }
 0x27f   : > { %816 = vadd.xlane.f32.xlu1 %v1832_v13  ;;  %v771_v38 = vmul.f32 0.0, %v1840_v5  ;;  %v1842_v39 = vpop.eup %1841 }
 0x280   : > { %v1844_v27 = vpop.eup %1843  ;;  %v776_v47 = vmul.f32 0.0, %v1842_v39 }
 0x281   : > { %v1846_v31 = vpop.eup %1845  ;;  %v2716_v54 = vmul.f32 0.0, %v1844_v27 }
 0x282   : > { %v1848_v43 = vpop.eup %1847  ;;  %v2718_v35 = vmul.f32 0.0, %v1846_v31 }
 0x283   : > { %v1850_v50 = vpop.eup %1849  ;;  %v2721_v45 = vmul.f32 0.0, %v1848_v43 }
 0x284   : > { %v1852_v37 = vpop.eup %1851  ;;  %v2727_v25 = vmul.f32 0.0, %v1850_v50 }
 0x285   : > { %v1854_v60 = vpop.eup %1853 }
 0x286   : > { %v1856_v52 = vpop.eup %1855  ;;  %v2725_v14 = vmul.f32 0.0, %v1854_v60 }
 0x287   : > { %v2730_v59 = vmul.f32 0.0, %v1856_v52 }
 0x2e9   : > { %v791_v21 = vpop.xlane.xlu0 %790 }
 0x2ea   : > { %v820_v34 = vadd.f32 %v791_v21, %v772_v6 }
 0x2ec   : > { %1857 = vrcp.f32 %v820_v34 }
 0x2ed   : > { %v793_v26 = vpop.xlane.xlu1 %792  ;;  %v787_v28 = vpop.xlane.xlu0 %786 }
 0x2ee   : > { %v818_v18 = vadd.f32 %v787_v28, %v770_v32  ;;  %v821_v20 = vadd.f32 %v793_v26, %v773_v36 }
 0x2f0   : > { %1859 = vrcp.f32 %v818_v18 }
 0x2f1   : > { %v789_v57 = vpop.xlane.xlu1 %788  ;;  %1861 = vrcp.f32 %v821_v20 }
 0x2f2   : > { %v819_v23 = vadd.f32 %v789_v57, %v771_v38 }
 0x2f4   : > { %1863 = vrcp.f32 %v819_v23 }
 0x2f5   : > { %1865 = vpow2.f32 %v702_v29 }
 0x2f6   : > { %v799_v61 = vpop.xlane.xlu0 %798  ;;  %1867 = vpow2.f32 %v704_v41  ;;  %v1858_v9 = vpop.eup %1857 }
 0x2f7   : > { %v824_v33 = vadd.f32 %v799_v61, %v776_v47  ;;  %1869 = vpow2.f32 %v703_v46 }
 0x2f8   : > { %v801_v0 = vpop.xlane.xlu1 %800  ;;  %1871 = vpow2.f32 %v705_v51 }
 0x2f9   : > { %v825_v40 = vadd.f32 %v801_v0, %v2718_v35  ;;  %1873 = vrcp.f32 %v824_v33  ;;  %v2733_v0 = vmul.f32 0.0, %v1852_v37 }
 0x2fa   : > { %v795_v7 = vpop.xlane.xlu0 %794  ;;  %v1860_v13 = vpop.eup %1859 }
 0x2fb   : > { %v822_v44 = vadd.f32 %v795_v7, %v2716_v54  ;;  %v1862_v22 = vpop.eup %1861 }
 0x2fc   : > { %v797_v16 = vpop.xlane.xlu1 %796 }
 0x2fd   : > { %v823_v48 = vadd.f32 %v797_v16, %v2721_v45  ;;  %1875 = vrcp.f32 %v822_v44 }
 0x2fe   : > { %v807_v24 = vpop.xlane.xlu0 %806  ;;  %1877 = vrcp.f32 %v825_v40  ;;  %v1864_v57 = vpop.eup %1863 }
 0x2ff   : > { %1879 = vrcp.f32 %v823_v48  ;;  %v828_v58 = vadd.f32 %v807_v24, %v2725_v14  ;;  %v1866_v8 = vpop.eup %1865 }
 0x300   : > { %v809_v42 = vpop.xlane.xlu1 %808  ;;  %v1868_v5 = vpop.eup %1867  ;;  %v782_v24 = vmul.f32 0.0, %v1866_v8 }
 0x301   : > { %v829_v11 = vadd.f32 %v809_v42, %v2730_v59  ;;  %v1870_v7 = vpop.eup %1869  ;;  %1881 = vrcp.f32 %v828_v58 }
 0x302   : > { %v803_v55 = vpop.xlane.xlu0 %802 }
 0x303   : > { %v826_v63 = vadd.f32 %v803_v55, %v2727_v25 }
 0x304   : > { %v805_v49 = vpop.xlane.xlu1 %804 }
 0x305   : > { %v827_v12 = vadd.f32 %v805_v49, %v2733_v0  ;;  %1883 = vrcp.f32 %v826_v63 }
 0x306   : > { %v811_v26 = vpop.xlane.xlu0 %810  ;;  %1885 = vrcp.f32 %v829_v11 }
 0x307   : > { %1887 = vrcp.f32 %v827_v12  ;;  %v830_v50 = vadd.f32 %v811_v26, %v782_v24 }
 0x308   : > { %v813_v1 = vpop.xlane.xlu1 %812 }
 0x30a   : > { %v815_v34 = vpop.xlane.xlu0 %814 }
 0x30c   : > { %v817_v27 = vpop.xlane.xlu1 %816 }
 0x337   : > { %v1620_v62 = vpop.f32.mrb[0].mxu1 }
 0x338   : > { %v1053_v2 = vadd.f32 %v1620_v62, %v772_v6  ;;  %v988_v3 = vpop.f32.mrb[1].mxu1 }
 0x339   : > { %v1051_v10 = vadd.f32 %v988_v3, %v770_v32  ;;  %v1621_v53 = vpop.f32.mrb[2].mxu1  ;;  %v1872_v32 = vpop.eup %1871 }
 0x33a   : > { %v1152_v17 = vmul.f32 %v1858_v9, %v1053_v2  ;;  %v1054_v19 = vadd.f32 %v1621_v53, %v773_v36  ;;  %v991_v21 = vpop.f32.mrb[3].mxu1  ;;  %v1874_v18 = vpop.eup %1873  ;;  %v785_v46 = vmul.f32 0.0, %v1872_v32 }
 0x33b   : > { %v1150_v28 = vmul.f32 %v1860_v13, %v1051_v10  ;;  %v1052_v56 = vadd.f32 %v991_v21, %v771_v38  ;;  %v784_v38 = vmul.f32 0.0, %v1868_v5  ;;  %v1876_v39 = vpop.eup %1875 }
 0x33c   : > { %v1153_v61 = vmul.f32 %v1862_v22, %v1054_v19  ;;  %v1878_v42 = vpop.eup %1877  ;;  %v833_v55 = vadd.f32 %v817_v27, %v785_v46 }
 0x33d   : > { %v1151_v30 = vmul.f32 %v1864_v57, %v1052_v56  ;;  %v832_v43 = vadd.f32 %v815_v34, %v784_v38  ;;  %v1880_v33 = vpop.eup %1879 }
 0x33e   : > { %v1499_v4 = vpack.c.bf16 %v1153_v61, %v1152_v17  ;;  %v1882_v52 = vpop.eup %1881 }
 0x33f   : > { %v1494_v6 = vpack.c.bf16 %v1151_v30, %v1150_v28  ;;  %1889 = vrcp.f32 %v832_v43  ;;  %v1884_v3 = vpop.eup %1883 }
 0x340   : > { %1531 = vst [vmem:[%s2739_s26 + $0x8] sm:$0xff] %v1499_v4   ;;  %v1624_v15 = vpop.f32.mrb[4].mxu1  ;;  %1891 = vrcp.f32 %v830_v50  ;;  %v1886_v13 = vpop.eup %1885 }
 0x341   : > { %1495 = vst [vmem:[%s2739_s26] sm:$0xff] %v1494_v6   ;;  %v1057_v36 = vadd.f32 %v1624_v15, %v776_v47  ;;  %v1004_v16 = vpop.f32.mrb[5].mxu1  ;;  %1893 = vrcp.f32 %v833_v55  ;;  %v1888_v19 = vpop.eup %1887 }
 0x342   : > { %v1055_v20 = vadd.f32 %v1004_v16, %v2716_v54  ;;  %v1625_v23 = vpop.f32.mrb[6].mxu1  ;;  %v783_v54 = vmul.f32 0.0, %v1870_v7 }
 0x343   : > { %v1156_v29 = vmul.f32 %v1874_v18, %v1057_v36  ;;  %v1058_v31 = vadd.f32 %v1625_v23, %v2718_v35  ;;  %v1007_v41 = vpop.f32.mrb[7].mxu1 }
 0x344   : > { %v1154_v47 = vmul.f32 %v1876_v39, %v1055_v20  ;;  %v1056_v51 = vadd.f32 %v1007_v41, %v2721_v45  ;;  %v831_v40 = vadd.f32 %v813_v1, %v783_v54 }
 0x345   : > { %v1157_v44 = vmul.f32 %v1878_v42, %v1058_v31 }
 0x346   : > { %v1155_v37 = vmul.f32 %v1880_v33, %v1056_v51  ;;  %1895 = vrcp.f32 %v831_v40 }
 0x347   : > { %v1509_v60 = vpack.c.bf16 %v1157_v44, %v1156_v29 }
 0x348   : > { %v1504_v48 = vpack.c.bf16 %v1155_v37, %v1154_v47  ;;  %v1628_v35 = vpop.f32.mrb[8].mxu1 }
 0x349   : > { %1533 = vst [vmem:[%s2739_s26 + $0x18] sm:$0xff] %v1509_v60   ;;  %v1061_v49 = vadd.f32 %v1628_v35, %v2725_v14  ;;  %v1020_v62 = vpop.f32.mrb[9].mxu1  ;;  %v1890_v58 = vpop.eup %1889 }
 0x34a   : > { %1532 = vst [vmem:[%s2739_s26 + $0x10] sm:$0xff] %v1504_v48   ;;  %v1059_v45 = vadd.f32 %v1020_v62, %v2727_v25  ;;  %v1629_v2 = vpop.f32.mrb[10].mxu1  ;;  %v1892_v63 = vpop.eup %1891 }
 0x34b   : > { %v1160_v9 = vmul.f32 %v1882_v52, %v1061_v49  ;;  %v1062_v10 = vadd.f32 %v1629_v2, %v2730_v59  ;;  %v1023_v53 = vpop.f32.mrb[11].mxu1  ;;  %v1894_v8 = vpop.eup %1893 }
 0x34c   : > { %v1158_v17 = vmul.f32 %v1884_v3, %v1059_v45  ;;  %v1060_v14 = vadd.f32 %v1023_v53, %v2733_v0 }
 0x34d   : > { %v1161_v21 = vmul.f32 %v1886_v13, %v1062_v10 }
 0x34e   : > { %v1159_v22 = vmul.f32 %v1888_v19, %v1060_v14 }
 0x34f   : > { %v1519_v25 = vpack.c.bf16 %v1161_v21, %v1160_v9 }
 0x350   : > { %v1514_v26 = vpack.c.bf16 %v1159_v22, %v1158_v17  ;;  %v1632_v28 = vpop.f32.mrb[12].mxu1  ;;  %v1896_v5 = vpop.eup %1895 }
 0x351   : > { %1535 = vst [vmem:[%s2739_s26 + $0x28] sm:$0xff] %v1519_v25   ;;  %v1065_v56 = vadd.f32 %v1632_v28, %v784_v38  ;;  %v1036_v57 = vpop.f32.mrb[13].mxu1 }
 0x352   : > { %1534 = vst [vmem:[%s2739_s26 + $0x20] sm:$0xff] %v1514_v26   ;;  %v1063_v59 = vadd.f32 %v1036_v57, %v782_v24  ;;  %v1633_v61 = vpop.f32.mrb[14].mxu1 }
 0x353   : > { %v1164_v0 = vmul.f32 %v1890_v58, %v1065_v56  ;;  %v1066_v1 = vadd.f32 %v1633_v61, %v785_v46  ;;  %v1039_v30 = vpop.f32.mrb[15].mxu1 }
 0x354   : > { %v1162_v11 = vmul.f32 %v1892_v63, %v1063_v59  ;;  %v1064_v4 = vadd.f32 %v1039_v30, %v783_v54 }
 0x355   : > { %v1165_v12 = vmul.f32 %v1894_v8, %v1066_v1 }
 0x356   : > { %v1163_v6 = vmul.f32 %v1896_v5, %v1064_v4 }
 0x357   : > { %v1529_v7 = vpack.c.bf16 %v1165_v12, %v1164_v0 }
 0x358   : > { %v1524_v15 = vpack.c.bf16 %v1163_v6, %v1162_v11 }
 0x359   : > { %1537 = vst [vmem:[%s2739_s26 + $0x38] sm:$0xff] %v1529_v7  }
 0x35a   : > { %1536 = vst [vmem:[%s2739_s26 + $0x30] sm:$0xff] %v1524_v15  }
 0x35b   : > { %2002 = shalt.err (!%p1999_p6)
}
 0x35c   : > { %s2003_s23 = scalar_lea.hbm %s2762_s4, 1024  ;;  %s2007_s11 = scalar_lea.hbm %s2913_s29, 4096 }
 0x35d   : > { %p2004_p4 = scmp.ne.s32.totalorder %s2762_s4, %s2003_s23  ;;  %p2008_p13 = scmp.lt.u32.totalorder %s2762_s4, %s2913_s29 }
 0x35e   : > { %p2009_p0 = scmp.lt.u32.totalorder %s2007_s11, %s2003_s23  ;;  %p2011_p11 = scmp.lt.u32.totalorder %s2003_s23, %s2762_s4 }
 0x35f   : > { %p2005_p2 = pnand %p2004_p4, %p2914_p5 }
 0x360   : > { %p2010_p10 = por %p2009_p0, %p2008_p13 }
 0x361   : > { %p2006_p9 = pneg %p2005_p2 }
 0x362   : > { %p2012_p8 = por %p2011_p11, %p2010_p10 }
 0x364   : > { %p2013_p1 = pnand %p2012_p8, %p2006_p9 }
 0x366   : > { %2016 = shalt.err (!%p2013_p1)
}
 0x367   : > { %s2152_s21 = smov 64   ;;  %s2153_s9 = smov 128  }
 0x368   : > { %s2154_s1 = smov 4  }
 0x369   : > { %1641 = dma.vmem_to_hbm [thread:$0]  (%p2914_p5), %s2757_s6, 1024, %s2762_s4, %s1247_s3, %s2152_s21, %s2153_s9, %s2154_s1  }
 0x36a PF: > { %p1658_p3 = scmp.ge.s32.totalorder %s2143_s25, 2  ;;  %s1279_s12 = sand.u32 1, %s2115_s18  }
 0x36b   : > { %p2915_p12 = scmp.ne.s32.totalorder %s2893_s22, 0  ;;  %s1280_s16 = scalar_lea.sflag [#allocation7], %s1279_s12 }
 0x36d   : > { %p1654_p7 = pnand %p1658_p3, %p2915_p12 }
 0x36f   : > { %2086 = dma.done.wait (!%p1654_p7), %s1280_s16, 1024  }
 0x370   : > { %2088 = vsyncadd (!%p1654_p7), %s1280_s16, 4294966272  ;;  %s22_s25 = sadd.s32 1, %s2143_s25   ;;  %s2917_s15 = sld [smem:[#allocation16_spill]] }
 0x371   : > { %p2795_p6 = scmp.ge.s32.totalorder %s22_s25, 6   ;;  %s2918_s7 = sld [smem:[#allocation17_spill]] }
 0x372   : > { %s2919_s20 = sld [smem:[#allocation25_spill]]  ;;  %s2920_s21 = sld [smem:[#allocation20_spill]] }
 0x373   : > { %s2921_s22 = sld [smem:[#allocation21_spill]]  ;;  %s2922_s23 = sld [smem:[#allocation22_spill]] }
 0x374   : > { %s2923_s24 = sld [smem:[#allocation23_spill]]  ;;  %s2924_s12 = smov %s2095_s13 }
 0x375   : > { %s2925_s13 = smov %s2099_s14  ;;  %s2926_s14 = smov %s2439_s5 }
 0x376   : > { %s2927_s16 = smov %s2111_s17  ;;  %s2928_s17 = smov %s2284_s30 }
 0x377   : > { %s2929_s18 = smov %s2119_s19  ;;  %s2930_s19 = smov %s2918_s7 }
 0x378   :  { %21 = sbr.rel (!%p2795_p6) target bundleno = 16 (0x10), region = 109 }
 0x37f   :  { %1285 = vsyncpa [#allocation6], 1 }
 0x380   :  { %1287 = vsyncpa [#allocation6 + $0x1], 1 }
 0x381   :  { %1288 = vsyncpa [#allocation9], 1 }
 0x382   :  { %1290 = vsyncpa [#allocation9 + $0x1], 1 }
 0x383   :  { %1291 = vsyncpa [#allocation7], 1 }
 0x384   :  { %1293 = vsyncpa [#allocation7 + $0x1], 1 }

</bundles_post_ra>
